<compile_context>
chip_gen: v5e
topology: v5e:2x2
jax: 0.10.0
libtpu: 0.0.40
codegen_flags: <defaults>
</compile_context>

<pallas_src>
import functools

import jax
import jax.numpy as jnp
from jax.experimental import pallas as pl
from jax.experimental.pallas import tpu as pltpu

_LANE = 128
_WIDE_LANES = 1024                       # preferred lane-dense width (8 vregs)
_ROW_TILE = 512                          # rows per tile in the tiled path
_SINGLE_BLOCK_BYTES = 2 * 1024 * 1024    # fused single-block fast-path cutoff
_VMEM_LIMIT = 32 * 1024 * 1024


def _round_up(a, b):
    return ((a + b - 1) // b) * b


# ---------------------------------------------------------------------------
# Fused single-block kernel (small inputs): sum + subtract in one pass.
# ---------------------------------------------------------------------------
def _fused_centered_kernel(x_ref, o_ref, *, inv_n):
    x = x_ref[...]                                # single load of the block
    total = jnp.sum(x, dtype=jnp.float32)         # f32 accumulation (XLU)
    mean = (total * inv_n).astype(o_ref.dtype)    # multiply by 1/N constant
    o_ref[...] = x - mean


# ---------------------------------------------------------------------------
# Tiled two-pass kernels (large inputs).
# ---------------------------------------------------------------------------
def _sum_kernel(x_ref, s_ref):
    @pl.when(pl.program_id(0) == 0)
    def _():
        s_ref[...] = jnp.zeros_like(s_ref)
    s_ref[...] += jnp.sum(x_ref[...], dtype=jnp.float32)


def _sub_kernel(mean_ref, x_ref, o_ref):
    # mean lives in SMEM; cast the scalar once, subtract in the source dtype.
    o_ref[...] = x_ref[...] - mean_ref[0, 0].astype(o_ref.dtype)


# ---------------------------------------------------------------------------
# Wrapper
# ---------------------------------------------------------------------------
def centered_layer(x):
    """Returns x - mean(x) (global mean over all elements), same shape/dtype."""
    if not jnp.issubdtype(x.dtype, jnp.floating):
        raise TypeError(f"centered_layer expects a floating dtype, got {x.dtype}")

    orig_shape = x.shape
    total = int(x.size)
    itemsize = jnp.dtype(x.dtype).itemsize
    inv_n = 1.0 / float(total)                    # trace-time constant

    # Lane-dense 2D view: last dim a multiple of 128 (1024 when big enough).
    ncols = _WIDE_LANES if total >= _WIDE_LANES else _LANE
    nrows = _round_up(total, ncols) // ncols
    padded_bytes = nrows * ncols * itemsize

    use_fused = padded_bytes <= _SINGLE_BLOCK_BYTES
    if use_fused:
        row_tile = nrows                          # whole array is one block
    else:
        row_tile = _ROW_TILE if nrows >= _ROW_TILE else _round_up(nrows, 8)
        nrows = _round_up(nrows, row_tile)

    flat = x.reshape(-1)
    pad = nrows * ncols - total
    if pad:
        flat = jnp.pad(flat, (0, pad))            # zeros: don't affect the sum
    x2d = flat.reshape(nrows, ncols)
    nbytes = nrows * ncols * itemsize

    if use_fused:
        out2d = pl.pallas_call(
            functools.partial(_fused_centered_kernel, inv_n=inv_n),
            out_shape=jax.ShapeDtypeStruct((nrows, ncols), x.dtype),
            cost_estimate=pl.CostEstimate(
                flops=2 * nrows * ncols, transcendentals=0,
                bytes_accessed=2 * nbytes),
        )(x2d)
    else:
        num_tiles = nrows // row_tile

        # Pass 1: tiled partial sums into a resident (1, 1) f32 accumulator.
        total_sum = pl.pallas_call(
            _sum_kernel,
            out_shape=jax.ShapeDtypeStruct((1, 1), jnp.float32),
            grid=(num_tiles,),
            in_specs=[pl.BlockSpec((row_tile, ncols), lambda i: (i, 0))],
            out_specs=pl.BlockSpec((1, 1), lambda i: (0, 0)),
            compiler_params=pltpu.CompilerParams(
                dimension_semantics=("arbitrary",),
                vmem_limit_bytes=_VMEM_LIMIT),
            cost_estimate=pl.CostEstimate(
                flops=nrows * ncols, transcendentals=0,
                bytes_accessed=nbytes + 4),
        )(x2d)

        mean2d = total_sum * jnp.float32(inv_n)   # (1, 1) f32 scalar mean

        # Pass 2: x - mean; mean broadcast from SMEM; row tiles in parallel.
        out2d = pl.pallas_call(
            _sub_kernel,
            out_shape=jax.ShapeDtypeStruct((nrows, ncols), x.dtype),
            grid=(num_tiles,),
            in_specs=[pl.BlockSpec(memory_space=pltpu.MemorySpace.SMEM),
                      pl.BlockSpec((row_tile, ncols), lambda i: (i, 0))],
            out_specs=pl.BlockSpec((row_tile, ncols), lambda i: (i, 0)),
            compiler_params=pltpu.CompilerParams(
                dimension_semantics=("parallel",),
                vmem_limit_bytes=_VMEM_LIMIT),
            cost_estimate=pl.CostEstimate(
                flops=nrows * ncols, transcendentals=0,
                bytes_accessed=2 * nbytes),
        )(mean2d, x2d)

    out_flat = out2d.reshape(-1)
    if pad:
        out_flat = out_flat[:total]
    return out_flat.reshape(orig_shape)


if __name__ == "__main__":
    k0, k1 = jax.random.split(jax.random.PRNGKey(0))

    # Small NCHW input (exercises the fused single-block fast path).
    x = jax.random.normal(k0, (2, 4, 16, 16), dtype=jnp.float32)
    y = centered_layer(x)
    jax.block_until_ready(y)
    y_ref = x - jnp.mean(x)
    assert y.shape == x.shape and y.dtype == x.dtype
    assert jnp.allclose(y, y_ref, atol=1e-5, rtol=1e-5)

    # Larger input (exercises the tiled two-pass reduce-then-subtract path).
    x_big = jax.random.normal(k1, (4, 8, 128, 256), dtype=jnp.float32)
    y_big = centered_layer(x_big)
    jax.block_until_ready(y_big)
    y_big_ref = x_big - jnp.mean(x_big)
    assert y_big.shape == x_big.shape and y_big.dtype == x_big.dtype
    assert jnp.allclose(y_big, y_big_ref, atol=1e-4, rtol=1e-4)

    print("KERNEL_OK")
</pallas_src>

<mosaic_0001>
module attributes {stable_mosaic.version = 11 : i64} {
  func.func @_fused_centered_kernel(%arg0: memref<2x1024xf32, #tpu.memory_space<vmem>>, %arg1: memref<2x1024xf32, #tpu.memory_space<vmem>>) attributes {dimension_semantics = [], scalar_prefetch = 0 : i64, scratch_operands = 0 : i64, tpu.core_type = #tpu.core_type<tc>} {
    %c0 = arith.constant 0 : index
    %c0_0 = arith.constant 0 : index
    %0 = vector.load %arg0[%c0, %c0_0] : memref<2x1024xf32, #tpu.memory_space<vmem>>, vector<2x1024xf32>
    %1 = vector.shape_cast %0 : vector<2x1024xf32> to vector<1x2x1024xf32>
    %cst = arith.constant dense<0.000000e+00> : vector<1xf32>
    %2 = vector.multi_reduction <add>, %1, %cst [1, 2] : vector<1x2x1024xf32> to vector<1xf32>
    %3 = vector.shape_cast %2 : vector<1xf32> to vector<1x1x1xf32>
    %4 = vector.extract %3[0, 0, 0] : f32 from vector<1x1x1xf32>
    %cst_1 = arith.constant 4.8828125E-4 : f32
    %5 = arith.mulf %4, %cst_1 : f32
    %6 = vector.broadcast %5 : f32 to vector<2x1024xf32>
    %7 = arith.subf %0, %6 : vector<2x1024xf32>
    %c0_2 = arith.constant 0 : index
    %c0_3 = arith.constant 0 : index
    %8 = vector.load %arg1[%c0_2, %c0_3] : memref<2x1024xf32, #tpu.memory_space<vmem>>, vector<2x1024xf32>
    tpu.vector_store %arg1[%c0_2, %c0_3], %7 {strides = array<i32>} : memref<2x1024xf32, #tpu.memory_space<vmem>>, vector<2x1024xf32>,
    return
  }
}

</mosaic_0001>

<bundles_post_ra>
// kernel: tpu_custom_call.1
= control target key start
LH: loop header
LB: loop body
LE: loop exit
PB: predicated region body
PF: predicated region fallthrough
CT: control target
= control target key end

     0   :  { %6 = vsyncpa [#allocation3], 0  ;;  %s176_s0 = inlined_call_operand.hbm [shape: f32[2,1024], index: 0, kind: input, shape index: {}]   ;;  %s177_s1 = inlined_call_operand.hbm [shape: f32[2,1024], index: 1, kind: output, shape index: {}]  }
   0x1   :  { %7 = vsyncpa [#allocation4], 0  ;;  %s13_s8 = sshll.u32 %s176_s0, 4  ;;  %s150_s9 = smov [#allocation2]   ;;  %s14_s8 = int_to_ptr.hbm [resolvable:$true] %s13_s8 }
   0x2   :  { %s15_s10 = sshll.u32 %s150_s9, 4  ;;  %s16_s10 = int_to_ptr.vmem [resolvable:$true] %s15_s10 }
   0x3   :  { %18 = dma.hbm_to_vmem [thread:$0]  %s14_s8, 256, %s16_s10, [#allocation3]  }
   0x4   :  { %146 = dma.done.wait [#allocation3], 256  }
   0x5   :  { %147 = vsyncadd [#allocation3], 4294967040  ;;  %v23_v0 = vld [vmem:[#allocation2] sm:$0xff]  ;;  %v24_v1 = vld [vmem:[#allocation2 + $0x8] sm:$0xff]  ;;  %vm46_vm0 = vcmask 1041408   ;;  %s151_s12 = smov [#allocation5]  }
   0x6   :  { %27 = vst [vmem:[#allocation1] ss:$4 sm:$0xff] %v23_v0  ;;  %s82_s13 = sshll.u32 %s151_s12, 4  ;;  %s84_s16 = sshll.u32 %s177_s1, 4  ;;  %s83_s13 = int_to_ptr.vmem [resolvable:$true] %s82_s13  ;;  %s85_s16 = int_to_ptr.hbm [resolvable:$true] %s84_s16 }
   0x7   :  { %29 = vst [vmem:[#allocation1 + $0x20] ss:$4 sm:$0xff] %v24_v1 }
   0xd   :  { %v30_v2 = vld.sshfl [vmem:[#allocation1] sm:$0xff pattern:$0x73625140]  ;;  %v31_v3 = vld.sshfl [vmem:[#allocation1 + $0x8] sm:$0xff pattern:$0x73625140] }
   0xe   :  { %v32_v4 = vld.sshfl [vmem:[#allocation1 + $0x10] sm:$0xff pattern:$0x73625140]  ;;  %v33_v5 = vld.sshfl [vmem:[#allocation1 + $0x18] sm:$0xff pattern:$0x73625140] }
   0xf   :  { %v47_v6 = vsel %vm46_vm0, %v30_v2, 0.0  ;;  %v48_v7 = vsel %vm46_vm0, %v31_v3, 0.0  ;;  %v50_v8 = vsel %vm46_vm0, %v32_v4, 0.0  ;;  %v34_v9 = vld.sshfl [vmem:[#allocation1 + $0x20] sm:$0xff pattern:$0x73625140] }
  0x10   :  { %v49_v10 = vadd.f32 %v48_v7, %v47_v6  ;;  %v52_v11 = vsel %vm46_vm0, %v33_v5, 0.0  ;;  %v35_v12 = vld.sshfl [vmem:[#allocation1 + $0x28] sm:$0xff pattern:$0x73625140]  ;;  %v54_v14 = vsel %vm46_vm0, %v34_v9, 0.0 }
  0x11   :  { %v36_v15 = vld.sshfl [vmem:[#allocation1 + $0x30] sm:$0xff pattern:$0x73625140]  ;;  %v56_v17 = vsel %vm46_vm0, %v35_v12, 0.0 }
  0x12   :  { %v51_v13 = vadd.f32 %v50_v8, %v49_v10  ;;  %v37_v18 = vld.sshfl [vmem:[#allocation1 + $0x38] sm:$0xff pattern:$0x73625140]  ;;  %v58_v20 = vsel %vm46_vm0, %v36_v15, 0.0 }
  0x13   :  { %v60_v22 = vsel %vm46_vm0, %v37_v18, 0.0 }
  0x14   :  { %v53_v16 = vadd.f32 %v52_v11, %v51_v13 }
  0x16   :  { %v55_v19 = vadd.f32 %v54_v14, %v53_v16 }
  0x18   :  { %v57_v21 = vadd.f32 %v56_v17, %v55_v19 }
  0x1a   :  { %v59_v23 = vadd.f32 %v58_v20, %v57_v21 }
  0x1c   :  { %v61_v24 = vadd.f32 %v60_v22, %v59_v23 }
  0x1e   :  { %62 = vadd.xlane.f32.xlu0 %v61_v24 }
  0x91   :  { %v63_v25 = vpop.xlane.xlu0 %62 }
  0x92   :  { %v64_v26 = vrot.slane %v63_v25, 4 }
  0x94   :  { %v65_v27 = vadd.f32 %v64_v26, %v63_v25 }
  0x96   :  { %v66_v28 = vrot.slane %v65_v27, 2 }
  0x98   :  { %v67_v29 = vadd.f32 %v66_v28, %v65_v27 }
  0x9a   :  { %v68_v30 = vrot.slane %v67_v29, 1 }
  0x9c   :  { %v69_v31 = vadd.f32 %v68_v30, %v67_v29 }
  0x9e   :  { %94 = vpush %v69_v31 }
  0xcf   :  { %s95_s0 = spop %94 }
  0xd0   :  { %s71_s11 = smul.f32 0.00048828125, %s95_s0 }
  0xd2   :  { %v72_v32 = vstv %s71_s11 }
  0xd3   :  { %v73_v33 = vsub.f32 %v23_v0, %v72_v32  ;;  %v74_v34 = vsub.f32 %v24_v1, %v72_v32 }
  0xd5   :  { %75 = vst [vmem:[#allocation5] sm:$0xff] %v73_v33 }
  0xd6   :  { %76 = vst [vmem:[#allocation5 + $0x8] sm:$0xff] %v74_v34 }
  0xd7   :  { %87 = dma.vmem_to_hbm [thread:$0]  %s83_s13, 256, %s85_s16, [#allocation4]  }
  0xd8   :  { %148 = dma.done.wait [#allocation4], 256  }
  0xd9   :  { %149 = vsyncadd [#allocation4], 4294967040 }
  0xda   :  { %92 = vsyncpa [#allocation3], 1 }
  0xdb   :  { %93 = vsyncpa [#allocation4], 1 }

</bundles_post_ra>
